<compile_context>
chip_gen: v7x
topology: tpu7x:2x2x1
jax: 0.10.0
libtpu: 0.0.40
codegen_flags: <defaults>
</compile_context>

<pallas_src>
import math

import jax
import jax.numpy as jnp
import numpy as np
from jax.experimental import pallas as pl
from jax.experimental.pallas import tpu as pltpu

LN_EPS = 1e-5


def _tvp_kernel(x_ref, w1_ref, w2_ref, idup_ref, mavg_ref, wh_ref, vecs_ref, bh_ref, out_ref):
    """Fused value+policy forward, slab-wide (no intra-vreg slicing).

    x_ref    : (TB, H)        state tile (streamed)
    w1_ref   : (H, 2H)        [vw1 | pw1]
    w2_ref   : (2H, 2H)       block-diag(vw2, pw2)
    idup_ref : (H, 2H)        [I_H | I_H]  (residual duplication on the MXU)
    mavg_ref : (2H, 2H)       block-diag(1/H): h @ mavg == per-half mean, lane-broadcast
    wh_ref   : (2H, OUT_PAD)  fused heads, final-LN gamma pre-folded, zero-padded to 128
    vecs_ref : (6, 2H)        rows: b1, g1, be1, b2, g2, be2  (each [val | pi])
    bh_ref   : (1, OUT_PAD)   fused head bias (final-LN beta pre-folded), zero-padded
    out_ref  : (TB, OUT_PAD)  lane-dense fused output
    """
    x = x_ref[...]                                                     # (TB, H)
    vecs = vecs_ref[...]                                               # (6, 2H)
    b1, g1, be1 = vecs[0:1, :], vecs[1:2, :], vecs[2:3, :]
    b2, g2, be2 = vecs[3:4, :], vecs[4:5, :], vecs[5:6, :]
    mavg = mavg_ref[...]                                               # (2H, 2H)

    # residual, duplicated into both branch halves via the (idle) MXU
    x2 = jnp.dot(x, idup_ref[...], preferred_element_type=jnp.float32)  # (TB, 2H)

    # --- resblock layer 1 (both branches fused) ---
    h = jnp.dot(x, w1_ref[...], preferred_element_type=jnp.float32) + b1
    mu = jnp.dot(h, mavg, preferred_element_type=jnp.float32)           # per-half mean
    c = h - mu
    var = jnp.dot(c * c, mavg, preferred_element_type=jnp.float32)      # per-half variance
    h = jnp.maximum(c * jax.lax.rsqrt(var + LN_EPS) * g1 + be1, 0.0)

    # --- resblock layer 2 + residual + ReLU ---
    h = jnp.dot(h, w2_ref[...], preferred_element_type=jnp.float32) + b2
    mu = jnp.dot(h, mavg, preferred_element_type=jnp.float32)
    c = h - mu
    var = jnp.dot(c * c, mavg, preferred_element_type=jnp.float32)
    h = jnp.maximum(c * jax.lax.rsqrt(var + LN_EPS) * g2 + be2 + x2, 0.0)

    # --- final LayerNorm (gamma/beta folded into head weights wrapper-side) ---
    mu = jnp.dot(h, mavg, preferred_element_type=jnp.float32)
    c = h - mu
    var = jnp.dot(c * c, mavg, preferred_element_type=jnp.float32)
    n = c * jax.lax.rsqrt(var + LN_EPS)

    # --- fused heads: all value heads + policy head, one unmasked lane-dense store ---
    out_ref[...] = (
        jnp.dot(n, wh_ref[...], preferred_element_type=jnp.float32) + bh_ref[...]
    ).astype(out_ref.dtype)


def trading_value_policy_forward(state, params, *, v_num, out_dtype=jnp.float32):
    """state: (B, H) float32.  Returns (values (v_num, B, S), policy (B, A))."""
    B, H = state.shape
    S = params["vhw"].shape[-1]
    A = params["phw"].shape[-1]
    VS = v_num * S
    OUT = VS + A
    OUT_PAD = ((OUT + 127) // 128) * 128          # lane-dense output slab
    f32 = jnp.float32

    # ---- wrapper-side parameter packing (layout plumbing only) ----
    w1 = jnp.concatenate([params["vw1"], params["pw1"]], axis=1)            # (H, 2H)
    w2 = jnp.zeros((2 * H, 2 * H), f32)
    w2 = w2.at[:H, :H].set(params["vw2"]).at[H:, H:].set(params["pw2"])     # block-diag
    idup = jnp.concatenate([jnp.eye(H, dtype=f32)] * 2, axis=1)             # (H, 2H) [I|I]
    mavg = jnp.zeros((2 * H, 2 * H), f32)
    mavg = mavg.at[:H, :H].set(1.0 / H).at[H:, H:].set(1.0 / H)             # per-half mean op

    vhw_flat = jnp.transpose(params["vhw"], (1, 0, 2)).reshape(H, VS)       # (H, v_num*S)
    wh0 = jnp.zeros((2 * H, OUT_PAD), f32)
    wh0 = wh0.at[:H, :VS].set(vhw_flat).at[H:, VS:OUT].set(params["phw"])
    bh0 = jnp.zeros((1, OUT_PAD), f32)
    bh0 = bh0.at[0, :VS].set(params["vhb"].reshape(VS)).at[0, VS:OUT].set(params["phb"][0])
    # fold the final LayerNorm affine (gamma/beta) into the head weights / bias
    lng = jnp.concatenate([params["vlng"], params["plng"]], axis=1)         # (1, 2H)
    lnb = jnp.concatenate([params["vlnb"], params["plnb"]], axis=1)         # (1, 2H)
    wh = lng.reshape(2 * H, 1) * wh0                                        # row-scaled
    bh = bh0 + lnb @ wh0

    vecs = jnp.concatenate(
        [
            jnp.concatenate([params["vb1"], params["pb1"]], axis=1),
            jnp.concatenate([params["vg1"], params["pg1"]], axis=1),
            jnp.concatenate([params["vbe1"], params["pbe1"]], axis=1),
            jnp.concatenate([params["vb2"], params["pb2"]], axis=1),
            jnp.concatenate([params["vg2"], params["pg2"]], axis=1),
            jnp.concatenate([params["vbe2"], params["pbe2"]], axis=1),
        ],
        axis=0,
    )                                                                        # (6, 2H)

    # ---- batch tiling: big tiles (amortize ~0.35us/step), tile count divides batch when
    #      possible, >=2 tiles for large batches so v7x's second TensorCore is used ----
    TB_CAP = 1024
    B8 = ((B + 7) // 8) * 8
    if B8 <= TB_CAP:
        num_tiles = 2 if B8 >= 512 else 1
    else:
        num_tiles = pl.cdiv(B8, TB_CAP)
    TB = ((pl.cdiv(B8, num_tiles) + 7) // 8) * 8
    B_pad = TB * num_tiles

    x = state if B_pad == B else jnp.pad(state, ((0, B_pad - B), (0, 0)))

    out = pl.pallas_call(
        _tvp_kernel,
        out_shape=jax.ShapeDtypeStruct((B_pad, OUT_PAD), out_dtype),
        grid_spec=pltpu.PrefetchScalarGridSpec(
            num_scalar_prefetch=0,
            grid=(num_tiles,),
            in_specs=[
                pl.BlockSpec((TB, H), lambda i: (i, 0)),              # state tile (streamed)
                pl.BlockSpec((H, 2 * H), lambda i: (0, 0)),           # w1        (resident)
                pl.BlockSpec((2 * H, 2 * H), lambda i: (0, 0)),       # w2        (resident)
                pl.BlockSpec((H, 2 * H), lambda i: (0, 0)),           # [I|I]     (resident)
                pl.BlockSpec((2 * H, 2 * H), lambda i: (0, 0)),       # Mavg      (resident)
                pl.BlockSpec((2 * H, OUT_PAD), lambda i: (0, 0)),     # head W    (resident)
                pl.BlockSpec((6, 2 * H), lambda i: (0, 0)),           # bias/LN   (resident)
                pl.BlockSpec((1, OUT_PAD), lambda i: (0, 0)),         # head bias (resident)
            ],
            out_specs=pl.BlockSpec((TB, OUT_PAD), lambda i: (i, 0)),
        ),
        compiler_params=pltpu.CompilerParams(dimension_semantics=("parallel",)),
    )(x, w1, w2, idup, mavg, wh, vecs, bh)

    if B_pad != B:
        out = out[:B]
    # post-kernel slices are tiny (OUT = v_num*S + A of the 128-lane slab per row)
    values = out[:, :VS].reshape(B, v_num, S).transpose(1, 0, 2)   # (v_num, B, S)
    policy = out[:, VS:OUT]                                        # (B, A)
    return values, policy


# ----------------------- deterministic parameter init -----------------------
def init_params(key, hidden_size, value_support_size, action_size, v_num):
    H, S, A = hidden_size, value_support_size, action_size
    ks = iter(jax.random.split(key, 32))

    def lin(k, fan_in, shape):
        bound = 1.0 / math.sqrt(fan_in)
        return jax.random.uniform(k, shape, jnp.float32, -bound, bound)

    params = {}
    # val_resblock
    params["vw1"] = lin(next(ks), H, (H, H)); params["vb1"] = lin(next(ks), H, (1, H))
    params["vg1"] = jnp.ones((1, H), jnp.float32); params["vbe1"] = jnp.zeros((1, H), jnp.float32)
    params["vw2"] = lin(next(ks), H, (H, H)); params["vb2"] = lin(next(ks), H, (1, H))
    params["vg2"] = jnp.ones((1, H), jnp.float32); params["vbe2"] = jnp.zeros((1, H), jnp.float32)
    # val_ln
    params["vlng"] = jnp.ones((1, H), jnp.float32); params["vlnb"] = jnp.zeros((1, H), jnp.float32)
    # value heads (stacked)
    params["vhw"] = lin(next(ks), H, (v_num, H, S)); params["vhb"] = lin(next(ks), H, (v_num, 1, S))
    # pi_resblock
    params["pw1"] = lin(next(ks), H, (H, H)); params["pb1"] = lin(next(ks), H, (1, H))
    params["pg1"] = jnp.ones((1, H), jnp.float32); params["pbe1"] = jnp.zeros((1, H), jnp.float32)
    params["pw2"] = lin(next(ks), H, (H, H)); params["pb2"] = lin(next(ks), H, (1, H))
    params["pg2"] = jnp.ones((1, H), jnp.float32); params["pbe2"] = jnp.zeros((1, H), jnp.float32)
    # pi_ln
    params["plng"] = jnp.ones((1, H), jnp.float32); params["plnb"] = jnp.zeros((1, H), jnp.float32)
    # policy head
    params["phw"] = lin(next(ks), H, (H, A)); params["phb"] = lin(next(ks), H, (1, A))
    return params


# ----------------------------- pure-JAX reference ----------------------------
def reference_forward(state, p, *, v_num):
    def ln(h, g, b):
        mu = h.mean(-1, keepdims=True)
        var = ((h - mu) ** 2).mean(-1, keepdims=True)
        return (h - mu) / jnp.sqrt(var + LN_EPS) * g + b

    def rb(x, w1, b1, g1, be1, w2, b2, g2, be2):
        h = jnp.maximum(ln(x @ w1 + b1, g1, be1), 0.0)
        h = ln(h @ w2 + b2, g2, be2)
        return jnp.maximum(h + x, 0.0)

    v = rb(state, p["vw1"], p["vb1"], p["vg1"], p["vbe1"],
           p["vw2"], p["vb2"], p["vg2"], p["vbe2"])
    v = ln(v, p["vlng"], p["vlnb"])
    values = jnp.stack([v @ p["vhw"][i] + p["vhb"][i] for i in range(v_num)], axis=0)

    pi = rb(state, p["pw1"], p["pb1"], p["pg1"], p["pbe1"],
            p["pw2"], p["pb2"], p["pg2"], p["pbe2"])
    pi = ln(pi, p["plng"], p["plnb"])
    policy = pi @ p["phw"] + p["phb"]
    return values, policy


if __name__ == "__main__":
    hidden_size = 32
    value_support_size = 21
    action_size = 5
    v_num = 2
    batch = 8

    key = jax.random.PRNGKey(0)
    k_state, k_params = jax.random.split(key)
    state = jax.random.normal(k_state, (batch, hidden_size), jnp.float32)
    params = init_params(k_params, hidden_size, value_support_size, action_size, v_num)

    values, policy = trading_value_policy_forward(state, params, v_num=v_num)
    jax.block_until_ready((values, policy))

    ref_values, ref_policy = reference_forward(state, params, v_num=v_num)
    assert values.shape == (v_num, batch, value_support_size)
    assert policy.shape == (batch, action_size)
    np.testing.assert_allclose(np.asarray(values), np.asarray(ref_values), atol=1e-4, rtol=1e-4)
    np.testing.assert_allclose(np.asarray(policy), np.asarray(ref_policy), atol=1e-4, rtol=1e-4)

    print("KERNEL_OK")
</pallas_src>

<mosaic_0001>
module attributes {stable_mosaic.version = 11 : i64} {
  func.func @_tvp_kernel(%arg0: i32, %arg1: memref<8x32xf32, #tpu.memory_space<vmem>>, %arg2: memref<32x64xf32, #tpu.memory_space<vmem>>, %arg3: memref<64x64xf32, #tpu.memory_space<vmem>>, %arg4: memref<32x64xf32, #tpu.memory_space<vmem>>, %arg5: memref<64x64xf32, #tpu.memory_space<vmem>>, %arg6: memref<64x128xf32, #tpu.memory_space<vmem>>, %arg7: memref<6x64xf32, #tpu.memory_space<vmem>>, %arg8: memref<1x128xf32, #tpu.memory_space<vmem>>, %arg9: memref<8x128xf32, #tpu.memory_space<vmem>>) attributes {dimension_semantics = [#tpu.dimension_semantics<parallel>], iteration_bounds = array<i64: 1>, scalar_prefetch = 0 : i64, scratch_operands = 0 : i64, tpu.core_type = #tpu.core_type<tc>, window_params = [{transform_indices = @transform_0, window_bounds = array<i64: 8, 32>}, {pipeline_mode = #tpu.pipeline_mode<synchronous>, transform_indices = @transform_1, window_bounds = array<i64: 32, 64>}, {pipeline_mode = #tpu.pipeline_mode<synchronous>, transform_indices = @transform_2, window_bounds = array<i64: 64, 64>}, {pipeline_mode = #tpu.pipeline_mode<synchronous>, transform_indices = @transform_3, window_bounds = array<i64: 32, 64>}, {pipeline_mode = #tpu.pipeline_mode<synchronous>, transform_indices = @transform_4, window_bounds = array<i64: 64, 64>}, {pipeline_mode = #tpu.pipeline_mode<synchronous>, transform_indices = @transform_5, window_bounds = array<i64: 64, 128>}, {pipeline_mode = #tpu.pipeline_mode<synchronous>, transform_indices = @transform_6, window_bounds = array<i64: 6, 64>}, {pipeline_mode = #tpu.pipeline_mode<synchronous>, transform_indices = @transform_7, window_bounds = array<i64: 1, 128>}, {transform_indices = @transform_8, window_bounds = array<i64: 8, 128>}]} {
    %c0 = arith.constant 0 : index
    %c0_0 = arith.constant 0 : index
    %0 = vector.load %arg1[%c0, %c0_0] : memref<8x32xf32, #tpu.memory_space<vmem>>, vector<8x32xf32>
    %c0_1 = arith.constant 0 : index
    %c0_2 = arith.constant 0 : index
    %1 = vector.load %arg7[%c0_1, %c0_2] : memref<6x64xf32, #tpu.memory_space<vmem>>, vector<6x64xf32>
    %2 = vector.extract_strided_slice %1 {offsets = [0, 0], sizes = [1, 64], strides = [1, 1]} : vector<6x64xf32> to vector<1x64xf32>
    %3 = vector.extract_strided_slice %1 {offsets = [1, 0], sizes = [1, 64], strides = [1, 1]} : vector<6x64xf32> to vector<1x64xf32>
    %4 = vector.extract_strided_slice %1 {offsets = [2, 0], sizes = [1, 64], strides = [1, 1]} : vector<6x64xf32> to vector<1x64xf32>
    %5 = vector.extract_strided_slice %1 {offsets = [3, 0], sizes = [1, 64], strides = [1, 1]} : vector<6x64xf32> to vector<1x64xf32>
    %6 = vector.extract_strided_slice %1 {offsets = [4, 0], sizes = [1, 64], strides = [1, 1]} : vector<6x64xf32> to vector<1x64xf32>
    %7 = vector.extract_strided_slice %1 {offsets = [5, 0], sizes = [1, 64], strides = [1, 1]} : vector<6x64xf32> to vector<1x64xf32>
    %c0_3 = arith.constant 0 : index
    %c0_4 = arith.constant 0 : index
    %8 = vector.load %arg5[%c0_3, %c0_4] : memref<64x64xf32, #tpu.memory_space<vmem>>, vector<64x64xf32>
    %c0_5 = arith.constant 0 : index
    %c0_6 = arith.constant 0 : index
    %9 = vector.load %arg4[%c0_5, %c0_6] : memref<32x64xf32, #tpu.memory_space<vmem>>, vector<32x64xf32>
    %cst = arith.constant dense<0.000000e+00> : vector<8x64xf32>
    %10 = tpu.matmul %0, %9, %cst {dimension_numbers = #tpu.dot_dimension_numbers<[1], [0], [0], [1], [0, 0, 1, 1], [], []>} : vector<8x32xf32>, vector<32x64xf32>, vector<8x64xf32> -> vector<8x64xf32>
    %c0_7 = arith.constant 0 : index
    %c0_8 = arith.constant 0 : index
    %11 = vector.load %arg2[%c0_7, %c0_8] : memref<32x64xf32, #tpu.memory_space<vmem>>, vector<32x64xf32>
    %cst_9 = arith.constant dense<0.000000e+00> : vector<8x64xf32>
    %12 = tpu.matmul %0, %11, %cst_9 {dimension_numbers = #tpu.dot_dimension_numbers<[1], [0], [0], [1], [0, 0, 1, 1], [], []>} : vector<8x32xf32>, vector<32x64xf32>, vector<8x64xf32> -> vector<8x64xf32>
    %13 = vector.broadcast %2 : vector<1x64xf32> to vector<8x64xf32>
    %14 = arith.addf %12, %13 : vector<8x64xf32>
    %cst_10 = arith.constant dense<0.000000e+00> : vector<8x64xf32>
    %15 = tpu.matmul %14, %8, %cst_10 {dimension_numbers = #tpu.dot_dimension_numbers<[1], [0], [0], [1], [0, 0, 1, 1], [], []>} : vector<8x64xf32>, vector<64x64xf32>, vector<8x64xf32> -> vector<8x64xf32>
    %16 = arith.subf %14, %15 : vector<8x64xf32>
    %17 = arith.mulf %16, %16 : vector<8x64xf32>
    %cst_11 = arith.constant dense<0.000000e+00> : vector<8x64xf32>
    %18 = tpu.matmul %17, %8, %cst_11 {dimension_numbers = #tpu.dot_dimension_numbers<[1], [0], [0], [1], [0, 0, 1, 1], [], []>} : vector<8x64xf32>, vector<64x64xf32>, vector<8x64xf32> -> vector<8x64xf32>
    %cst_12 = arith.constant 9.99999974E-6 : f32
    %19 = vector.broadcast %cst_12 : f32 to vector<8x64xf32>
    %20 = arith.addf %18, %19 : vector<8x64xf32>
    %21 = math.rsqrt %20 : vector<8x64xf32>
    %22 = arith.mulf %16, %21 : vector<8x64xf32>
    %23 = vector.broadcast %3 : vector<1x64xf32> to vector<8x64xf32>
    %24 = arith.mulf %22, %23 : vector<8x64xf32>
    %25 = vector.broadcast %4 : vector<1x64xf32> to vector<8x64xf32>
    %26 = arith.addf %24, %25 : vector<8x64xf32>
    %cst_13 = arith.constant 0.000000e+00 : f32
    %27 = vector.broadcast %cst_13 : f32 to vector<8x64xf32>
    %28 = arith.maximumf %26, %27 : vector<8x64xf32>
    %c0_14 = arith.constant 0 : index
    %c0_15 = arith.constant 0 : index
    %29 = vector.load %arg3[%c0_14, %c0_15] : memref<64x64xf32, #tpu.memory_space<vmem>>, vector<64x64xf32>
    %cst_16 = arith.constant dense<0.000000e+00> : vector<8x64xf32>
    %30 = tpu.matmul %28, %29, %cst_16 {dimension_numbers = #tpu.dot_dimension_numbers<[1], [0], [0], [1], [0, 0, 1, 1], [], []>} : vector<8x64xf32>, vector<64x64xf32>, vector<8x64xf32> -> vector<8x64xf32>
    %31 = vector.broadcast %5 : vector<1x64xf32> to vector<8x64xf32>
    %32 = arith.addf %30, %31 : vector<8x64xf32>
    %cst_17 = arith.constant dense<0.000000e+00> : vector<8x64xf32>
    %33 = tpu.matmul %32, %8, %cst_17 {dimension_numbers = #tpu.dot_dimension_numbers<[1], [0], [0], [1], [0, 0, 1, 1], [], []>} : vector<8x64xf32>, vector<64x64xf32>, vector<8x64xf32> -> vector<8x64xf32>
    %34 = arith.subf %32, %33 : vector<8x64xf32>
    %35 = arith.mulf %34, %34 : vector<8x64xf32>
    %cst_18 = arith.constant dense<0.000000e+00> : vector<8x64xf32>
    %36 = tpu.matmul %35, %8, %cst_18 {dimension_numbers = #tpu.dot_dimension_numbers<[1], [0], [0], [1], [0, 0, 1, 1], [], []>} : vector<8x64xf32>, vector<64x64xf32>, vector<8x64xf32> -> vector<8x64xf32>
    %cst_19 = arith.constant 9.99999974E-6 : f32
    %37 = vector.broadcast %cst_19 : f32 to vector<8x64xf32>
    %38 = arith.addf %36, %37 : vector<8x64xf32>
    %39 = math.rsqrt %38 : vector<8x64xf32>
    %40 = arith.mulf %34, %39 : vector<8x64xf32>
    %41 = vector.broadcast %6 : vector<1x64xf32> to vector<8x64xf32>
    %42 = arith.mulf %40, %41 : vector<8x64xf32>
    %43 = vector.broadcast %7 : vector<1x64xf32> to vector<8x64xf32>
    %44 = arith.addf %42, %43 : vector<8x64xf32>
    %45 = arith.addf %44, %10 : vector<8x64xf32>
    %cst_20 = arith.constant 0.000000e+00 : f32
    %46 = vector.broadcast %cst_20 : f32 to vector<8x64xf32>
    %47 = arith.maximumf %45, %46 : vector<8x64xf32>
    %cst_21 = arith.constant dense<0.000000e+00> : vector<8x64xf32>
    %48 = tpu.matmul %47, %8, %cst_21 {dimension_numbers = #tpu.dot_dimension_numbers<[1], [0], [0], [1], [0, 0, 1, 1], [], []>} : vector<8x64xf32>, vector<64x64xf32>, vector<8x64xf32> -> vector<8x64xf32>
    %49 = arith.subf %47, %48 : vector<8x64xf32>
    %50 = arith.mulf %49, %49 : vector<8x64xf32>
    %cst_22 = arith.constant dense<0.000000e+00> : vector<8x64xf32>
    %51 = tpu.matmul %50, %8, %cst_22 {dimension_numbers = #tpu.dot_dimension_numbers<[1], [0], [0], [1], [0, 0, 1, 1], [], []>} : vector<8x64xf32>, vector<64x64xf32>, vector<8x64xf32> -> vector<8x64xf32>
    %cst_23 = arith.constant 9.99999974E-6 : f32
    %52 = vector.broadcast %cst_23 : f32 to vector<8x64xf32>
    %53 = arith.addf %51, %52 : vector<8x64xf32>
    %54 = math.rsqrt %53 : vector<8x64xf32>
    %55 = arith.mulf %49, %54 : vector<8x64xf32>
    %c0_24 = arith.constant 0 : index
    %c0_25 = arith.constant 0 : index
    %56 = vector.load %arg6[%c0_24, %c0_25] : memref<64x128xf32, #tpu.memory_space<vmem>>, vector<64x128xf32>
    %cst_26 = arith.constant dense<0.000000e+00> : vector<8x128xf32>
    %57 = tpu.matmul %55, %56, %cst_26 {dimension_numbers = #tpu.dot_dimension_numbers<[1], [0], [0], [1], [0, 0, 1, 1], [], []>} : vector<8x64xf32>, vector<64x128xf32>, vector<8x128xf32> -> vector<8x128xf32>
    %c0_27 = arith.constant 0 : index
    %c0_28 = arith.constant 0 : index
    %58 = vector.load %arg8[%c0_27, %c0_28] : memref<1x128xf32, #tpu.memory_space<vmem>>, vector<1x128xf32>
    %59 = vector.broadcast %58 : vector<1x128xf32> to vector<8x128xf32>
    %60 = arith.addf %57, %59 : vector<8x128xf32>
    %c0_29 = arith.constant 0 : index
    %c0_30 = arith.constant 0 : index
    %61 = vector.load %arg9[%c0_29, %c0_30] : memref<8x128xf32, #tpu.memory_space<vmem>>, vector<8x128xf32>
    tpu.vector_store %arg9[%c0_29, %c0_30], %60 {strides = array<i32>} : memref<8x128xf32, #tpu.memory_space<vmem>>, vector<8x128xf32>,
    return
  }
  func.func @transform_0(%arg0: i32) -> (i32, i32) {
    %c0_i32 = arith.constant 0 : i32
    %c0_i32_0 = arith.constant 0 : i32
    return %arg0, %c0_i32 : i32, i32
  }
  func.func @transform_1(%arg0: i32) -> (i32, i32) {
    %c0_i32 = arith.constant 0 : i32
    %c0_i32_0 = arith.constant 0 : i32
    %c0_i32_1 = arith.constant 0 : i32
    return %c0_i32, %c0_i32_0 : i32, i32
  }
  func.func @transform_2(%arg0: i32) -> (i32, i32) {
    %c0_i32 = arith.constant 0 : i32
    %c0_i32_0 = arith.constant 0 : i32
    %c0_i32_1 = arith.constant 0 : i32
    return %c0_i32, %c0_i32_0 : i32, i32
  }
  func.func @transform_3(%arg0: i32) -> (i32, i32) {
    %c0_i32 = arith.constant 0 : i32
    %c0_i32_0 = arith.constant 0 : i32
    %c0_i32_1 = arith.constant 0 : i32
    return %c0_i32, %c0_i32_0 : i32, i32
  }
  func.func @transform_4(%arg0: i32) -> (i32, i32) {
    %c0_i32 = arith.constant 0 : i32
    %c0_i32_0 = arith.constant 0 : i32
    %c0_i32_1 = arith.constant 0 : i32
    return %c0_i32, %c0_i32_0 : i32, i32
  }
  func.func @transform_5(%arg0: i32) -> (i32, i32) {
    %c0_i32 = arith.constant 0 : i32
    %c0_i32_0 = arith.constant 0 : i32
    %c0_i32_1 = arith.constant 0 : i32
    return %c0_i32, %c0_i32_0 : i32, i32
  }
  func.func @transform_6(%arg0: i32) -> (i32, i32) {
    %c0_i32 = arith.constant 0 : i32
    %c0_i32_0 = arith.constant 0 : i32
    %c0_i32_1 = arith.constant 0 : i32
    return %c0_i32, %c0_i32_0 : i32, i32
  }
  func.func @transform_7(%arg0: i32) -> (i32, i32) {
    %c0_i32 = arith.constant 0 : i32
    %c0_i32_0 = arith.constant 0 : i32
    %c0_i32_1 = arith.constant 0 : i32
    return %c0_i32, %c0_i32_0 : i32, i32
  }
  func.func @transform_8(%arg0: i32) -> (i32, i32) {
    %c0_i32 = arith.constant 0 : i32
    %c0_i32_0 = arith.constant 0 : i32
    return %arg0, %c0_i32 : i32, i32
  }
}

</mosaic_0001>

<bundles_post_ra>
// kernel: tpu_custom_call.1
= control target key start
LH: loop header
LB: loop body
LE: loop exit
PB: predicated region body
PF: predicated region fallthrough
CT: control target
= control target key end

     0   :  { %13 = vsyncpa [#allocation3], 0  ;;  %s1776_s0 = inlined_call_operand.hbm [shape: f32[8,32], index: 0, kind: input, shape index: {}]   ;;  %s1777_s1 = inlined_call_operand.hbm [shape: f32[32,64], index: 1, kind: input, shape index: {}]   ;;  %s1778_s2 = inlined_call_operand.hbm [shape: f32[64,64], index: 2, kind: input, shape index: {}]   ;;  %s1779_s3 = inlined_call_operand.hbm [shape: f32[32,64], index: 3, kind: input, shape index: {}]   ;;  %s1780_s4 = inlined_call_operand.hbm [shape: f32[64,64], index: 4, kind: input, shape index: {}]   ;;  %s1781_s5 = inlined_call_operand.hbm [shape: f32[64,128], index: 5, kind: input, shape index: {}]   ;;  %s1782_s6 = inlined_call_operand.vmem [shape: f32[6,64], index: 6, kind: input, shape index: {}]   ;;  %s1783_s7 = inlined_call_operand.vmem [shape: f32[1,128], index: 7, kind: input, shape index: {}]   ;;  %s1784_s8 = inlined_call_operand.hbm [shape: f32[8,128], index: 8, kind: output, shape index: {}]  }
   0x1   :  { %14 = vsyncpa [#allocation6], 0 }
   0x2   :  { %15 = vsyncpa [#allocation9], 0 }
   0x3   :  { %16 = vsyncpa [#allocation12], 0 }
   0x4   :  { %17 = vsyncpa [#allocation4], 0  ;;  %s1499_s27 = smov [#allocation5]   ;;  %s1335_s9 = scalar_lea.hbm %s1777_s1, 512 }
   0x5   :  { %s33_s28 = sshll.u32 %s1499_s27, 4  ;;  %p1336_p0 = scmp.ne.s32.totalorder %s1777_s1, %s1335_s9  ;;  %s34_s28 = int_to_ptr.vmem [resolvable:$true] %s33_s28 }
   0x6   :  { %p1339_p1 = scmp.lt.u32.totalorder %s1335_s9, %s1777_s1 }
   0x8   :  { %p1341_p2 = pnand %p1339_p1, %p1336_p0 }
   0xa   :  { %1344 = shalt.err (!%p1341_p2)
}
   0xb   :  { %s1345_s14 = scalar_lea.vmem %s34_s28, 512  ;;  %p1350_p4 = scmp.lt.s32.totalorder %s34_s28, %s34_s28 }
   0xc   :  { %p1346_p3 = scmp.ne.s32.totalorder %s34_s28, %s1345_s14  ;;  %p1351_p5 = scmp.lt.s32.totalorder %s1345_s14, %s1345_s14 }
   0xe   :  { %p1352_p6 = por %p1351_p5, %p1350_p4 }
  0x10   :  { %p1353_p7 = pnand %p1352_p6, %p1346_p3 }
  0x12   :  { %1356 = shalt.err (!%p1353_p7)
}
  0x13   :  { %s1500_s15 = smov 128   ;;  %s1501_s16 = smov 8  }
  0x14   :  { %39 = dma.hbm_to_vmem [thread:$0]  %s1777_s1, 512, %s34_s28, [#allocation6], %s1500_s15, %s1500_s15, %s1501_s16  }
  0x15   :  { %s1502_s19 = smov [#allocation8]   ;;  %s1503_s21 = smov [#allocation2]  }
  0x16   :  { %s57_s20 = sshll.u32 %s1502_s19, 4  ;;  %s24_s22 = sshll.u32 %s1503_s21, 4  ;;  %s58_s20 = int_to_ptr.vmem [resolvable:$true] %s57_s20  ;;  %s25_s22 = int_to_ptr.vmem [resolvable:$true] %s24_s22 }
  0x17   :  { %s1357_s25 = scalar_lea.hbm %s1779_s3, 512 }
  0x18   :  { %p1358_p8 = scmp.ne.s32.totalorder %s1779_s3, %s1357_s25  ;;  %p1361_p9 = scmp.lt.u32.totalorder %s1357_s25, %s1779_s3 }
  0x1a   :  { %p1363_p10 = pnand %p1361_p9, %p1358_p8 }
  0x1c   :  { %1366 = shalt.err (!%p1363_p10)
}
  0x1d   :  { %s1367_s1 = scalar_lea.vmem %s58_s20, 512  ;;  %p1372_p12 = scmp.lt.s32.totalorder %s58_s20, %s58_s20 }
  0x1e   :  { %p1368_p11 = scmp.ne.s32.totalorder %s58_s20, %s1367_s1  ;;  %p1373_p13 = scmp.lt.s32.totalorder %s1367_s1, %s1367_s1 }
  0x20   :  { %p1374_p0 = por %p1373_p13, %p1372_p12 }
  0x22   :  { %p1375_p1 = pnand %p1374_p0, %p1368_p11 }
  0x24   :  { %1378 = shalt.err (!%p1375_p1)
}
  0x25   :  { %63 = dma.hbm_to_vmem [thread:$0]  %s1779_s3, 512, %s58_s20, [#allocation9], %s1500_s15, %s1500_s15, %s1501_s16  }
  0x26   :  { %s1379_s12 = scalar_lea.hbm %s1776_s0, 128 }
  0x27   :  { %p1380_p2 = scmp.ne.s32.totalorder %s1776_s0, %s1379_s12  ;;  %p1383_p3 = scmp.lt.u32.totalorder %s1379_s12, %s1776_s0 }
  0x29   :  { %p1385_p4 = pnand %p1383_p3, %p1380_p2 }
  0x2b   :  { %1388 = shalt.err (!%p1385_p4)
}
  0x2c   :  { %s1389_s19 = scalar_lea.vmem %s25_s22, 128  ;;  %p1394_p6 = scmp.lt.s32.totalorder %s25_s22, %s25_s22 }
  0x2d   :  { %p1390_p5 = scmp.ne.s32.totalorder %s25_s22, %s1389_s19  ;;  %p1395_p7 = scmp.lt.s32.totalorder %s1389_s19, %s1389_s19 }
  0x2f   :  { %p1396_p8 = por %p1395_p7, %p1394_p6 }
  0x31   :  { %p1397_p9 = pnand %p1396_p8, %p1390_p5 }
  0x33   :  { %1400 = shalt.err (!%p1397_p9)
}
  0x34   :  { %27 = dma.hbm_to_vmem [thread:$0]  %s1776_s0, 128, %s25_s22, [#allocation3]  }
  0x35   :  { %s1504_s21 = smov [#allocation7]   ;;  %s1505_s24 = smov [#allocation10]  }
  0x36   :  { %s45_s23 = sshll.u32 %s1504_s21, 4  ;;  %s69_s25 = sshll.u32 %s1505_s24, 4  ;;  %s46_s23 = int_to_ptr.vmem [resolvable:$true] %s45_s23  ;;  %s70_s25 = int_to_ptr.vmem [resolvable:$true] %s69_s25 }
  0x37   :  { %s1401_s29 = scalar_lea.hbm %s1778_s2, 1024 }
  0x38   :  { %p1402_p10 = scmp.ne.s32.totalorder %s1778_s2, %s1401_s29  ;;  %p1405_p11 = scmp.lt.u32.totalorder %s1401_s29, %s1778_s2 }
  0x3a   :  { %p1407_p12 = pnand %p1405_p11, %p1402_p10 }
  0x3c   :  { %1410 = shalt.err (!%p1407_p12)
}
  0x3d   :  { %s1411_s0 = scalar_lea.vmem %s46_s23, 1024  ;;  %p1416_p0 = scmp.lt.s32.totalorder %s46_s23, %s46_s23 }
  0x3e   :  { %p1412_p13 = scmp.ne.s32.totalorder %s46_s23, %s1411_s0  ;;  %p1417_p1 = scmp.lt.s32.totalorder %s1411_s0, %s1411_s0 }
  0x40   :  { %p1418_p2 = por %p1417_p1, %p1416_p0 }
  0x42   :  { %p1419_p3 = pnand %p1418_p2, %p1412_p13 }
  0x44   :  { %1422 = shalt.err (!%p1419_p3)
}
  0x45   :  { %51 = dma.hbm_to_vmem [thread:$0]  %s1778_s2, 1024, %s46_s23, [#allocation6], %s1500_s15, %s1500_s15, %s1501_s16  }
  0x46   :  { %s1423_s13 = scalar_lea.hbm %s1780_s4, 1024 }
  0x47   :  { %p1424_p4 = scmp.ne.s32.totalorder %s1780_s4, %s1423_s13  ;;  %p1427_p5 = scmp.lt.u32.totalorder %s1423_s13, %s1780_s4 }
  0x49   :  { %p1429_p6 = pnand %p1427_p5, %p1424_p4 }
  0x4b   :  { %1432 = shalt.err (!%p1429_p6)
}
  0x4c   :  { %s1433_s3 = scalar_lea.vmem %s70_s25, 1024  ;;  %p1438_p8 = scmp.lt.s32.totalorder %s70_s25, %s70_s25 }
  0x4d   :  { %p1434_p7 = scmp.ne.s32.totalorder %s70_s25, %s1433_s3  ;;  %p1439_p9 = scmp.lt.s32.totalorder %s1433_s3, %s1433_s3 }
  0x4f   :  { %p1440_p10 = por %p1439_p9, %p1438_p8 }
  0x51   :  { %p1441_p11 = pnand %p1440_p10, %p1434_p7 }
  0x53   :  { %1444 = shalt.err (!%p1441_p11)
}
  0x54   :  { %75 = dma.hbm_to_vmem [thread:$0]  %s1780_s4, 1024, %s70_s25, [#allocation9], %s1500_s15, %s1500_s15, %s1501_s16  }
  0x55   :  { %s1506_s21 = smov [#allocation11]   ;;  %s1445_s27 = scalar_lea.hbm %s1781_s5, 1024 }
  0x56   :  { %s81_s23 = sshll.u32 %s1506_s21, 4  ;;  %p1446_p12 = scmp.ne.s32.totalorder %s1781_s5, %s1445_s27  ;;  %s82_s23 = int_to_ptr.vmem [resolvable:$true] %s81_s23 }
  0x57   :  { %p1449_p13 = scmp.lt.u32.totalorder %s1445_s27, %s1781_s5 }
  0x59   :  { %p1451_p0 = pnand %p1449_p13, %p1446_p12 }
  0x5b   :  { %1454 = shalt.err (!%p1451_p0)
}
  0x5c   :  { %s1455_s9 = scalar_lea.vmem %s82_s23, 1024  ;;  %p1460_p2 = scmp.lt.s32.totalorder %s82_s23, %s82_s23 }
  0x5d   :  { %p1456_p1 = scmp.ne.s32.totalorder %s82_s23, %s1455_s9  ;;  %p1461_p3 = scmp.lt.s32.totalorder %s1455_s9, %s1455_s9 }
  0x5f   :  { %p1462_p4 = por %p1461_p3, %p1460_p2 }
  0x61   :  { %p1463_p5 = pnand %p1462_p4, %p1456_p1 }
  0x63   :  { %1466 = shalt.err (!%p1463_p5)
}
  0x64   :  { %87 = dma.hbm_to_vmem [thread:$0]  %s1781_s5, 1024, %s82_s23, [#allocation12], %s1500_s15, %s1500_s15, %s1501_s16  }
  0x65   :  { %1489 = dma.done.wait [#allocation3], 128  }
  0x66   :  { %1490 = vsyncadd [#allocation3], 4294967168 }
  0x67   :  { %1491 = dma.done.wait [#allocation6], 1536  }
  0x68   :  { %1492 = vsyncadd [#allocation6], 4294965760 }
  0x69   :  { %1493 = dma.done.wait [#allocation9], 1536  }
  0x6a   :  { %1494 = vsyncadd [#allocation9], 4294965760 }
  0x6b   :  { %1495 = dma.done.wait [#allocation12], 1024  }
  0x6c   :  { %1496 = vsyncadd [#allocation12], 4294966272  ;;  %v1507_v0 = vmov 0.0|0.0   ;;  %vm1508_vm0 = vmmov 0   ;;  %v1509_v1 = vmov 0.0   ;;  %v198_v2 = vld [vmem:[#allocation5] sm:$0xff]  ;;  %v202_v27 = vlaneseq }
  0x6d   :  { %1215 = vmatprep.subr.bf16.mxu1 %v1507_v0  ;;  %1054 = vmatprep.mubr.msk.f32.mxu1 %vm1508_vm0, %v1509_v1  ;;  %v199_v3 = vld [vmem:[#allocation5 + $0x8] sm:$0xff]  ;;  %v200_v4 = vld [vmem:[#allocation5 + $0x10] sm:$0xff]  ;;  %v201_v6 = vld [vmem:[#allocation5 + $0x18] sm:$0xff]  ;;  %vm124_vm1 = vcmask 261120   ;;  %vm276_vm2 = vcmask 523264   ;;  %s1510_s0 = smov [#allocation13]  }
  0x6e   :  { %1209 = vmatprep.subr.bf16.mxu0 %v1507_v0  ;;  %1043 = vmatprep.mubr.msk.f32.mxu0 %vm1508_vm0, %v1509_v1  ;;  %v1216_v5 = vpack.c.bf16 %v199_v3, %v198_v2  ;;  %v120_v7 = vld [vmem:[#allocation8] sm:$0xff]  ;;  %v121_v8 = vld [vmem:[#allocation8 + $0x8] sm:$0xff]  ;;  %v122_v9 = vld [vmem:[#allocation8 + $0x10] sm:$0xff]  ;;  %v1219_v11 = vpack.c.bf16 %v201_v6, %v200_v4  ;;  %v1681_v28 = vshrl.u32 %v202_v27, 7  ;;  %s930_s22 = sshll.u32 %s1510_s0, 4  ;;  %s931_s22 = int_to_ptr.vmem [resolvable:$true] %s930_s22 }
  0x6f   :  { %v123_v10 = vld [vmem:[#allocation8 + $0x18] sm:$0xff]  ;;  %v1210_v12 = vpack.c.bf16 %v121_v8, %v120_v7  ;;  %v112_v14 = vld [vmem:[#allocation10] sm:$0xff]  ;;  %v113_v15 = vld [vmem:[#allocation10 + $0x8] sm:$0xff]  ;;  %s1467_s10 = scalar_lea.vmem %s931_s22, 128  ;;  %p1472_p7 = scmp.lt.s32.totalorder %s931_s22, %s931_s22 }
  0x70   :  { %1217 = vmatpush3.bf16.msra.mxu1 %v1216_v5  ;;  %v1213_v13 = vpack.c.bf16 %v123_v10, %v122_v9  ;;  %v110_v16 = vld [vmem:[#allocation2] sm:$0xff]  ;;  %v1652_v17 = vpack.c.bf16 %v113_v15, %v112_v14  ;;  %v114_v18 = vld [vmem:[#allocation10 + $0x10] sm:$0xff]  ;;  %v116_v21 = vld [vmem:[#allocation10 + $0x20] sm:$0xff]  ;;  %v204_v29 = vsub.s32 0, %v1681_v28  ;;  %v429_v56 = vsub.s32 1, %v1681_v28  ;;  %p1468_p6 = scmp.ne.s32.totalorder %s931_s22, %s1467_s10  ;;  %p1473_p8 = scmp.lt.s32.totalorder %s1467_s10, %s1467_s10 }
  0x71   :  { %1218 = vmatprep.subr.bf16.mxu1 %v1507_v0  ;;  %1211 = vmatpush3.bf16.msra.mxu0 %v1210_v12  ;;  %v115_v19 = vld [vmem:[#allocation10 + $0x18] sm:$0xff]  ;;  %v117_v22 = vld [vmem:[#allocation10 + $0x28] sm:$0xff]  ;;  %v118_v24 = vld [vmem:[#allocation10 + $0x30] sm:$0xff]  ;;  %v434_v57 = vsub.s32 2, %v1681_v28  ;;  %v448_v3 = vsub.s32 3, %v1681_v28  ;;  %v675_v15 = vsub.s32 4, %v1681_v28 }
  0x72   :  { %1212 = vmatprep.subr.bf16.mxu0 %v1507_v0  ;;  %v1660_v20 = vpack.c.bf16 %v115_v19, %v114_v18  ;;  %v1668_v23 = vpack.c.bf16 %v117_v22, %v116_v21  ;;  %v119_v25 = vld [vmem:[#allocation10 + $0x38] sm:$0xff]  ;;  %v438_v41 = vld [vmem:[#allocation7] sm:$0xff]  ;;  %v439_v42 = vld [vmem:[#allocation7 + $0x8] sm:$0xff]  ;;  %p1474_p9 = por %p1473_p8, %p1472_p7 }
  0x73   :  { %v1675_v26 = vpack.c.bf16 %v119_v25, %v118_v24  ;;  %v1687_v30 = vld [vmem:[%s1782_s6] sm:$0x3f]  ;;  %v1246_v43 = vpack.c.bf16 %v439_v42, %v438_v41  ;;  %v440_v44 = vld [vmem:[#allocation7 + $0x10] sm:$0xff]  ;;  %v442_v47 = vld [vmem:[#allocation7 + $0x20] sm:$0xff] }
  0x74   :  { %1220 = vmatpush3.bf16.msra.mxu1 %v1219_v11  ;;  %v205_v31 = vrot.slane %v1687_v30, %v204_v29  ;;  %v441_v45 = vld [vmem:[#allocation7 + $0x18] sm:$0xff]  ;;  %v443_v48 = vld [vmem:[#allocation7 + $0x28] sm:$0xff]  ;;  %v444_v50 = vld [vmem:[#allocation7 + $0x30] sm:$0xff]  ;;  %v430_v58 = vrot.slane %v1687_v30, %v429_v56  ;;  %v435_v61 = vrot.slane %v1687_v30, %v434_v57  ;;  %v449_v4 = vrot.slane %v1687_v30, %v448_v3  ;;  %p1475_p10 = pnand %p1474_p9, %p1468_p6 }
  0x75   :  { %1233 = vmatprep.subr.bf16.mxu1 %v1507_v0  ;;  %1214 = vmatpush3.bf16.msra.mxu0 %v1213_v13  ;;  %v1249_v46 = vpack.c.bf16 %v441_v45, %v440_v44  ;;  %v1252_v49 = vpack.c.bf16 %v443_v48, %v442_v47  ;;  %v445_v51 = vld [vmem:[#allocation7 + $0x38] sm:$0xff]  ;;  %v835_v29 = vld [vmem:[#allocation11] sm:$0xff] }
  0x76   :  { %1221 = vmatprep.subr.bf16.mxu0 %v1507_v0  ;;  %v1255_v52 = vpack.c.bf16 %v445_v51, %v444_v50  ;;  %v951_v45 = vld [vmem:[%s1783_s7] ss:$0 sm:$0xff] }
  0x77   :  { %1055 = vmatmul.mubr.msk.f32.vlgmr.msra.gmra.mrb[0].mxu1 %vm124_vm1, %v110_v16 }
  0x78   :  { %1235 = vmatpush3.bf16.msra.mxu1 %v1652_v17  ;;  %1092 = vmatprep.mubr.msk.f32.mxu1 %vm1508_vm0, %v1509_v1 }
  0x79   :  { %1044 = vmatmul.mubr.msk.f32.vlgmr.msra.gmra.mrb[0].mxu0 %vm124_vm1, %v110_v16  ;;  %1236 = vmatprep.subr.bf16.mxu1 %v1507_v0  ;;  %v680_v16 = vsub.s32 5, %v1681_v28 }
  0x7a   :  { %1223 = vmatpush3.bf16.msra.mxu0 %v1652_v17  ;;  %1073 = vmatprep.mubr.msk.f32.mxu0 %vm1508_vm0, %v1509_v1 }
  0x7b   :  { %1224 = vmatprep.subr.bf16.mxu0 %v1507_v0 }
  0x7c   :  { %1238 = vmatpush3.bf16.msra.mxu1 %v1660_v20 }
  0x7d   :  { %1239 = vmatprep.subr.bf16.mxu1 %v1507_v0 }
  0x7e   :  { %1226 = vmatpush3.bf16.msra.mxu0 %v1660_v20 }
  0x7f   :  { %1227 = vmatprep.subr.bf16.mxu0 %v1507_v0 }
  0x80   :  { %1241 = vmatpush3.bf16.msra.mxu1 %v1668_v23 }
  0x81   :  { %1242 = vmatprep.subr.bf16.mxu1 %v1507_v0 }
  0x82   :  { %1229 = vmatpush3.bf16.msra.mxu0 %v1668_v23 }
  0x83   :  { %1230 = vmatprep.subr.bf16.mxu0 %v1507_v0 }
  0x84   :  { %1244 = vmatpush3.bf16.msra.mxu1 %v1675_v26 }
  0x85   :  { %1257 = vmatprep.subr.bf16.mxu1 %v1507_v0 }
  0x86   :  { %1232 = vmatpush3.bf16.msra.mxu0 %v1675_v26 }
  0x87   :  { %1245 = vmatprep.subr.bf16.mxu0 %v1507_v0 }
 0x14a   :  { %v272_v32 = vpop.f32.mrb[0].mxu1 }
 0x14b   :  { %v273_v33 = vadd.f32 %v272_v32, %v205_v31  ;;  %v1056_v34 = vpop.f32.mrb[1].mxu1  ;;  %v836_v31 = vld [vmem:[#allocation11 + $0x8] sm:$0xff] }
 0x14c   :  { %v1690_v35 = vpop.f32.mrb[0].mxu0  ;;  %v1306_v32 = vpack.c.bf16 %v836_v31, %v835_v29 }
 0x14d   :  { %1074 = vmatmul.mubr.msk.f32.vlgmr.msra.gmra.mrb[2].mxu0 %vm276_vm2, %v273_v33  ;;  %v1045_v36 = vpop.f32.mrb[1].mxu0 }
 0x14e   :  { %1111 = vmatprep.mubr.msk.f32.mxu0 %vm1508_vm0, %v1509_v1  ;;  %1247 = vmatpush3.bf16.msra.mxu0 %v1246_v43  ;;  %v840_v36 = vld [vmem:[#allocation11 + $0x28] sm:$0xff] }
 0x14f   :  { %1248 = vmatprep.subr.bf16.mxu0 %v1507_v0 }
 0x152   :  { %1250 = vmatpush3.bf16.msra.mxu0 %v1249_v46 }
 0x153   :  { %1251 = vmatprep.subr.bf16.mxu0 %v1507_v0 }
 0x156   :  { %1253 = vmatpush3.bf16.msra.mxu0 %v1252_v49 }
 0x157   :  { %1254 = vmatprep.subr.bf16.mxu0 %v1507_v0 }
 0x15a   :  { %1256 = vmatpush3.bf16.msra.mxu0 %v1255_v52 }
 0x15b   :  { %1269 = vmatprep.subr.bf16.mxu0 %v1507_v0 }
 0x220   :  { %v346_v37 = vpop.f32.mrb[2].mxu0 }
 0x221   :  { %v350_v38 = vsub.f32 %v273_v33, %v346_v37  ;;  %v1075_v39 = vpop.f32.mrb[3].mxu0  ;;  %v838_v33 = vld [vmem:[#allocation11 + $0x18] sm:$0xff] }
 0x223   :  { %v351_v40 = vmul.f32 %v350_v38, %v350_v38 }
 0x225   :  { %1093 = vmatmul.mubr.msk.f32.vlgmr.msra.gmra.mrb[2].mxu1 %vm276_vm2, %v351_v40 }
 0x226   :  { %1259 = vmatpush3.bf16.msra.mxu1 %v1652_v17  ;;  %1130 = vmatprep.mubr.msk.f32.mxu1 %vm1508_vm0, %v1509_v1 }
 0x227   :  { %1260 = vmatprep.subr.bf16.mxu1 %v1507_v0 }
 0x22a   :  { %1262 = vmatpush3.bf16.msra.mxu1 %v1660_v20 }
 0x22b   :  { %1263 = vmatprep.subr.bf16.mxu1 %v1507_v0 }
 0x22e   :  { %1265 = vmatpush3.bf16.msra.mxu1 %v1668_v23 }
 0x22f   :  { %1266 = vmatprep.subr.bf16.mxu1 %v1507_v0 }
 0x232   :  { %1268 = vmatpush3.bf16.msra.mxu1 %v1675_v26 }
 0x233   :  { %1281 = vmatprep.subr.bf16.mxu1 %v1507_v0 }
 0x2f8   :  { %v421_v53 = vpop.f32.mrb[2].mxu1 }
 0x2f9   :  { %v422_v54 = vadd.f32 1e-05, %v421_v53  ;;  %v1094_v55 = vpop.f32.mrb[3].mxu1 }
 0x2fb   :  { %1329 = vrsqrt.f32 %v422_v54 }
 0x305   :  { %v1330_v59 = vpop.eup %1329 }
 0x306   :  { %v426_v60 = vmul.f32 %v1330_v59, %v350_v38  ;;  %v842_v38 = vld [vmem:[#allocation11 + $0x38] sm:$0xff] }
 0x308   :  { %v431_v62 = vmul.f32 %v430_v58, %v426_v60 }
 0x30a   :  { %v436_v63 = vadd.f32 %v435_v61, %v431_v62 }
 0x30c   :  { %v437_v2 = vmax.f32 %v436_v63, 0.0 }
 0x30e   :  { %1112 = vmatmul.mubr.msk.f32.vlgmr.msra.gmra.mrb[4].mxu0 %vm276_vm2, %v437_v2 }
 0x30f   :  { %1271 = vmatpush3.bf16.msra.mxu0 %v1652_v17  ;;  %1149 = vmatprep.mubr.msk.f32.mxu0 %vm1508_vm0, %v1509_v1 }
 0x310   :  { %1272 = vmatprep.subr.bf16.mxu0 %v1507_v0 }
 0x313   :  { %1274 = vmatpush3.bf16.msra.mxu0 %v1660_v20 }
 0x314   :  { %1275 = vmatprep.subr.bf16.mxu0 %v1507_v0 }
 0x317   :  { %1277 = vmatpush3.bf16.msra.mxu0 %v1668_v23 }
 0x318   :  { %1278 = vmatprep.subr.bf16.mxu0 %v1507_v0 }
 0x31b   :  { %1280 = vmatpush3.bf16.msra.mxu0 %v1675_v26 }
 0x31c   :  { %1293 = vmatprep.subr.bf16.mxu0 %v1507_v0 }
 0x3e1   :  { %v519_v5 = vpop.f32.mrb[4].mxu0 }
 0x3e2   :  { %v520_v6 = vadd.f32 %v519_v5, %v449_v4  ;;  %v1113_v7 = vpop.f32.mrb[5].mxu0 }
 0x3e4   :  { %1131 = vmatmul.mubr.msk.f32.vlgmr.msra.gmra.mrb[4].mxu1 %vm276_vm2, %v520_v6 }
 0x3e5   :  { %1283 = vmatpush3.bf16.msra.mxu1 %v1652_v17  ;;  %1168 = vmatprep.mubr.msk.f32.mxu1 %vm1508_vm0, %v1509_v1 }
 0x3e6   :  { %1284 = vmatprep.subr.bf16.mxu1 %v1507_v0 }
 0x3e9   :  { %1286 = vmatpush3.bf16.msra.mxu1 %v1660_v20 }
 0x3ea   :  { %1287 = vmatprep.subr.bf16.mxu1 %v1507_v0 }
 0x3ed   :  { %1289 = vmatpush3.bf16.msra.mxu1 %v1668_v23 }
 0x3ee   :  { %1290 = vmatprep.subr.bf16.mxu1 %v1507_v0 }
 0x3f1   :  { %1292 = vmatpush3.bf16.msra.mxu1 %v1675_v26 }
 0x3f2   :  { %1305 = vmatprep.subr.bf16.mxu1 %v1507_v0 }
 0x4b7   :  { %v592_v8 = vpop.f32.mrb[4].mxu1 }
 0x4b8   :  { %v596_v9 = vsub.f32 %v520_v6, %v592_v8  ;;  %v1132_v10 = vpop.f32.mrb[5].mxu1 }
 0x4ba   :  { %v597_v11 = vmul.f32 %v596_v9, %v596_v9 }
 0x4bc   :  { %1150 = vmatmul.mubr.msk.f32.vlgmr.msra.gmra.mrb[6].mxu0 %vm276_vm2, %v597_v11 }
 0x4bd   :  { %1295 = vmatpush3.bf16.msra.mxu0 %v1652_v17  ;;  %1187 = vmatprep.mubr.msk.f32.mxu0 %vm1508_vm0, %v1509_v1  ;;  %v676_v17 = vrot.slane %v1687_v30, %v675_v15 }
 0x4be   :  { %1296 = vmatprep.subr.bf16.mxu0 %v1507_v0 }
 0x4c1   :  { %1298 = vmatpush3.bf16.msra.mxu0 %v1660_v20  ;;  %v681_v20 = vrot.slane %v1687_v30, %v680_v16  ;;  %v837_v30 = vld [vmem:[#allocation11 + $0x10] sm:$0xff] }
 0x4c2   :  { %1299 = vmatprep.subr.bf16.mxu0 %v1507_v0  ;;  %v1309_v34 = vpack.c.bf16 %v838_v33, %v837_v30 }
 0x4c5   :  { %1301 = vmatpush3.bf16.msra.mxu0 %v1668_v23 }
 0x4c6   :  { %1302 = vmatprep.subr.bf16.mxu0 %v1507_v0 }
 0x4c9   :  { %1304 = vmatpush3.bf16.msra.mxu0 %v1675_v26 }
 0x58f   :  { %v667_v12 = vpop.f32.mrb[6].mxu0 }
 0x590   :  { %v668_v13 = vadd.f32 1e-05, %v667_v12  ;;  %v1151_v14 = vpop.f32.mrb[7].mxu0 }
 0x592   :  { %1331 = vrsqrt.f32 %v668_v13 }
 0x59c   :  { %v1332_v18 = vpop.eup %1331 }
 0x59d   :  { %v672_v19 = vmul.f32 %v1332_v18, %v596_v9 }
 0x59f   :  { %v677_v21 = vmul.f32 %v676_v17, %v672_v19 }
 0x5a1   :  { %v682_v22 = vadd.f32 %v681_v20, %v677_v21 }
 0x5a3   :  { %v683_v23 = vadd.f32 %v682_v22, %v1690_v35  ;;  %v839_v35 = vld [vmem:[#allocation11 + $0x20] sm:$0xff] }
 0x5a4   :  { %v1312_v37 = vpack.c.bf16 %v840_v36, %v839_v35 }
 0x5a5   :  { %v684_v24 = vmax.f32 %v683_v23, 0.0 }
 0x5a7   :  { %1169 = vmatmul.mubr.msk.f32.vlgmr.msra.gmra.mrb[6].mxu1 %vm276_vm2, %v684_v24 }
 0x5a8   :  { %1206 = vmatprep.mubr.msk.f32.mxu1 %vm1508_vm0, %v1509_v1  ;;  %1307 = vmatpush3.bf16.msra.mxu1 %v1306_v32  ;;  %v841_v1 = vld [vmem:[#allocation11 + $0x30] sm:$0xff] }
 0x5a9   :  { %1308 = vmatprep.subr.bf16.mxu1 %v1507_v0  ;;  %v1315_v39 = vpack.c.bf16 %v842_v38, %v841_v1 }
 0x5ac   :  { %1310 = vmatpush3.bf16.msra.mxu1 %v1309_v34 }
 0x5ad   :  { %1311 = vmatprep.subr.bf16.mxu1 %v1507_v0 }
 0x5b0   :  { %1313 = vmatpush3.bf16.msra.mxu1 %v1312_v37 }
 0x5b1   :  { %1314 = vmatprep.subr.bf16.mxu1 %v1507_v0 }
 0x5b4   :  { %1316 = vmatpush3.bf16.msra.mxu1 %v1315_v39 }
 0x67a   :  { %v754_v25 = vpop.f32.mrb[6].mxu1 }
 0x67b   :  { %v758_v26 = vsub.f32 %v684_v24, %v754_v25  ;;  %v1170_v27 = vpop.f32.mrb[7].mxu1 }
 0x67d   :  { %v759_v28 = vmul.f32 %v758_v26, %v758_v26 }
 0x67f   :  { %1188 = vmatmul.mubr.msk.f32.vlgmr.msra.gmra.mrb[8].mxu0 %vm276_vm2, %v759_v28 }
 0x752   :  { %v829_v40 = vpop.f32.mrb[8].mxu0 }
 0x753   :  { %v830_v41 = vadd.f32 1e-05, %v829_v40  ;;  %v1189_v42 = vpop.f32.mrb[9].mxu0 }
 0x755   :  { %1333 = vrsqrt.f32 %v830_v41 }
 0x75f   :  { %v1334_v43 = vpop.eup %1333 }
 0x760   :  { %v834_v44 = vmul.f32 %v1334_v43, %v758_v26 }
 0x762   :  { %1207 = vmatmul.mubr.msk.f32.vlgmr.msra.gmra.mrb[8].mxu1 %vm276_vm2, %v834_v44 }
 0x835   :  { %v919_v46 = vpop.f32.mrb[8].mxu1 }
 0x836   :  { %v920_v47 = vadd.f32 %v951_v45, %v919_v46  ;;  %v1208_v48 = vpop.f32.mrb[9].mxu1 }
 0x838   :  { %923 = vst [vmem:[#allocation13] sm:$0xff] %v920_v47 }
 0x839   :  { %1478 = shalt.err (!%p1475_p10)
}
 0x83a   :  { %s1479_s13 = scalar_lea.hbm %s1784_s8, 128 }
 0x83b   :  { %p1480_p11 = scmp.ne.s32.totalorder %s1784_s8, %s1479_s13  ;;  %p1483_p12 = scmp.lt.u32.totalorder %s1479_s13, %s1784_s8 }
 0x83d   :  { %p1485_p13 = pnand %p1483_p12, %p1480_p11 }
 0x83f   :  { %1488 = shalt.err (!%p1485_p13)
}
 0x840   :  { %933 = dma.vmem_to_hbm [thread:$0]  %s931_s22, 128, %s1784_s8, [#allocation4]  }
 0x841   :  { %1497 = dma.done.wait [#allocation4], 128  }
 0x842   :  { %1498 = vsyncadd [#allocation4], 4294967168 }
 0x843   :  { %937 = vsyncpa [#allocation3], 1 }
 0x844   :  { %938 = vsyncpa [#allocation6], 1 }
 0x845   :  { %939 = vsyncpa [#allocation9], 1 }
 0x846   :  { %940 = vsyncpa [#allocation12], 1 }
 0x847   :  { %941 = vsyncpa [#allocation4], 1 }

</bundles_post_ra>
